<compile_context>
chip_gen: v7x
topology: tpu7x:2x2x1
jax: 0.10.0
libtpu: 0.0.40
codegen_flags: <defaults>
</compile_context>

<pallas_src>
import functools
import math

import jax
import jax.numpy as jnp
import numpy as np
from jax.experimental import pallas as pl
from jax.experimental.pallas import tpu as pltpu


# ----------------------------- Pallas kernel --------------------------------
def _axial_attn_kernel(q_ref, k_ref, v_ref, o_ref, *, D, G):
    """Refs are (Bt, L, G*D) lane-dense VMEM tiles.

    Each of the G lane sub-slices of width D is an independent attention
    problem (adjacent problems folded into the lane axis by the wrapper).
    Loads/stores use the full lane-dense slab; the sub-slices are taken
    in-register with static slices.
    """
    q = q_ref[...]                       # (Bt, L, G*D), input dtype
    k = k_ref[...]
    v = v_ref[...]

    scale = jnp.asarray(1.0 / math.sqrt(D), dtype=jnp.float32)

    outs = []
    for g in range(G):                   # static unroll over lane sub-slices
        lo = g * D
        qg = q[:, :, lo:lo + D]          # (Bt, L, D)
        kg = k[:, :, lo:lo + D]
        vg = v[:, :, lo:lo + D]

        # s = q @ k^T per batch element; f32 accumulation on the MXU.
        s = jnp.einsum("bld,bmd->blm", qg, kg,
                       preferred_element_type=jnp.float32)      # (Bt, L, L) f32
        s = s * scale                                           # scale in f32

        # Numerically stable softmax, statistics in f32.
        m = jnp.max(s, axis=-1, keepdims=True)
        p = jnp.exp(s - m)
        denom = jnp.sum(p, axis=-1, keepdims=True)              # (Bt, L, 1) f32

        # PV matmul in the input dtype (f32 accumulate); exact normalization
        # (approx reciprocal previously failed the tolerance check).
        pv = jnp.einsum("blm,bmd->bld", p.astype(vg.dtype), vg,
                        preferred_element_type=jnp.float32)     # (Bt, L, D) f32
        outs.append(pv / denom)

    out = outs[0] if G == 1 else jnp.concatenate(outs, axis=-1)  # (Bt, L, G*D)
    # Single unmasked store of the full lane-dense slab.
    o_ref[...] = out.astype(o_ref.dtype)


# ----------------------------- sizing helpers --------------------------------
def _round_up(x, m):
    return -(-x // m) * m


def _vmem_budget():
    """(usable VMEM budget for tiles, vmem_limit_bytes for the compiler)."""
    try:
        cap = int(pltpu.get_tpu_info().vmem_capacity_bytes)
    except Exception:
        cap = 64 * 1024 * 1024          # conservative (v7x per-TC physical)
    limit = min(int(cap * 0.75), 96 * 1024 * 1024)   # leave headroom vs physical
    budget = max(8 * 1024 * 1024, int(limit * 0.6))  # headroom under the limit
    return budget, limit


def _pick_group(B, D):
    """How many adjacent problems to fold into the lane axis (G*D ~ 128)."""
    if D >= 128:
        return 1
    g_max = max(1, 128 // D)
    for g in range(g_max, 0, -1):
        if B % g == 0:
            return g
    return 1


def _pick_block_b(Bg, L, GD, itemsize, budget):
    """Batch-tile size (problems per grid step), padding-aware.

    Per-problem VMEM cost counts lane (128) and sublane (8 f32 / 16 bf16)
    tiling padding for the double-buffered q/k/v/out tiles, plus the in-kernel
    f32 logits (one group member live at a time) and the f32 output slab.
    """
    sub = {4: 8, 2: 16, 1: 32}.get(itemsize, 8)
    Lp_s = _round_up(L, sub)             # sublane-padded rows of IO tiles
    GDp = _round_up(GD, 128)             # lane-padded IO width
    Lp8 = _round_up(L, 8)                # f32 sublane pad for scratch
    Lp128 = _round_up(L, 128)            # lane pad of the logits

    io_per_b = 4 * 2 * Lp_s * GDp * itemsize            # q,k,v,out double-buffered
    scratch_per_b = 2 * Lp8 * Lp128 * 4 + Lp8 * GDp * 4  # s+p (1 live) + f32 out
    per_b = io_per_b + scratch_per_b

    bt_max = max(1, budget // per_b)
    # Keep >= ~4 grid steps (when the batch allows) so the software pipeline
    # actually overlaps DMA with compute.
    bt_target = max(1, min(bt_max, -(-Bg // 4)))

    # Prefer a divisor of Bg so no jnp.pad (extra HBM traffic) is needed.
    bt = 1
    for cand in range(int(bt_target), 0, -1):
        if Bg % cand == 0:
            bt = cand
            break
    if bt * 8 < bt_target:
        # Pathological batch (e.g. large prime): accept padding instead of a
        # tiny tile + huge step count.
        bt = int(bt_target)
    return int(bt)


# --------------------------- batched attention -------------------------------
def _batched_attention(q, k, v):
    """q, k, v: (B, L, D) -> (B, L, D) scaled-dot-product attention per batch."""
    B, L, D = q.shape
    G = _pick_group(B, D)
    Bg = B // G
    GD = G * D

    def fold(x):
        if G == 1:
            return x
        return (x.reshape(Bg, G, L, D).transpose(0, 2, 1, 3).reshape(Bg, L, GD))

    def unfold(x):
        if G == 1:
            return x
        return (x.reshape(Bg, L, G, D).transpose(0, 2, 1, 3).reshape(B, L, D))

    qf, kf, vf = fold(q), fold(k), fold(v)

    budget, vmem_limit = _vmem_budget()
    bt = _pick_block_b(Bg, L, GD, qf.dtype.itemsize, budget)

    if Bg % bt == 0:
        nb = Bg // bt
        Bp = Bg
    else:
        nb = int(pl.cdiv(Bg, bt))
        Bp = nb * bt
        pad = ((0, Bp - Bg), (0, 0), (0, 0))
        qf = jnp.pad(qf, pad)
        kf = jnp.pad(kf, pad)
        vf = jnp.pad(vf, pad)

    spec = pl.BlockSpec((bt, L, GD), lambda b: (b, 0, 0))
    kernel = functools.partial(_axial_attn_kernel, D=D, G=G)

    out = pl.pallas_call(
        kernel,
        out_shape=jax.ShapeDtypeStruct((Bp, L, GD), qf.dtype),
        grid=(nb,),
        in_specs=[spec, spec, spec],
        out_specs=spec,
        compiler_params=pltpu.CompilerParams(
            dimension_semantics=("parallel",),      # shards batch steps across TCs
            vmem_limit_bytes=int(vmem_limit)),
    )(qf, kf, vf)

    if Bp != Bg:
        out = out[:Bg]
    return unfold(out)


# ------------------------------ JAX glue -------------------------------------
def axial_attention(q, k, v, n_dim, axial_dim, decode_step=None, decode_idx=None):
    """JAX/Pallas equivalent of AxialAttention.forward.

    q, k, v: (batch, n_head, d1, ..., d_ndim, head_dim).
    decode_step / decode_idx are accepted and ignored, matching the reference
    forward (which receives but never uses them).
    """
    # __init__ axis arithmetic
    if axial_dim < 0:
        ad = 2 + n_dim + 1 + axial_dim
    else:
        ad = axial_dim + 2

    # shift_dim(x, ad, -2)  ==  moveaxis(x, ad, -2)
    qs = jnp.moveaxis(q, ad, -2)
    ks = jnp.moveaxis(k, ad, -2)
    vs = jnp.moveaxis(v, ad, -2)

    old_shape = vs.shape
    L, D = qs.shape[-2], qs.shape[-1]
    B = int(np.prod(old_shape[:-2]))

    q2 = qs.reshape(B, L, D)      # flatten(end_dim=-3)
    k2 = ks.reshape(B, L, D)
    v2 = vs.reshape(B, L, D)

    out = _batched_attention(q2, k2, v2)

    out = out.reshape(old_shape)
    out = jnp.moveaxis(out, -2, ad)   # shift_dim(out, -2, ad)
    return out


# --------------------------- pure-JAX reference -------------------------------
def _reference(q, k, v, n_dim, axial_dim):
    if axial_dim < 0:
        ad = 2 + n_dim + 1 + axial_dim
    else:
        ad = axial_dim + 2
    qs = jnp.moveaxis(q, ad, -2)
    ks = jnp.moveaxis(k, ad, -2)
    vs = jnp.moveaxis(v, ad, -2)
    old_shape = vs.shape
    L, D = qs.shape[-2], qs.shape[-1]
    q2 = qs.reshape(-1, L, D)
    k2 = ks.reshape(-1, L, D)
    v2 = vs.reshape(-1, L, D)
    attn = jnp.einsum('bld,bmd->blm', q2, k2) / np.sqrt(D)
    attn = jax.nn.softmax(attn, axis=-1)
    out = jnp.einsum('blm,bmd->bld', attn, v2)
    out = out.reshape(old_shape)
    return jnp.moveaxis(out, -2, ad)


# ------------------------------- main -----------------------------------------
if __name__ == "__main__":
    # AxialAttention(n_dim=2, axial_dim=0): attend along the first spatial dim.
    n_dim = 2
    axial_dim = 0

    batch, n_head, H, W, head_dim = 2, 2, 8, 8, 32
    key = jax.random.PRNGKey(0)
    kq, kk, kv = jax.random.split(key, 3)
    q = jax.random.normal(kq, (batch, n_head, H, W, head_dim), dtype=jnp.float32)
    k = jax.random.normal(kk, (batch, n_head, H, W, head_dim), dtype=jnp.float32)
    v = jax.random.normal(kv, (batch, n_head, H, W, head_dim), dtype=jnp.float32)

    out = axial_attention(q, k, v, n_dim, axial_dim)
    out = jax.block_until_ready(out)

    ref = jax.block_until_ready(_reference(q, k, v, n_dim, axial_dim))
    np.testing.assert_allclose(np.asarray(out), np.asarray(ref),
                               rtol=2e-3, atol=2e-3)

    print("KERNEL_OK")
</pallas_src>

<mosaic_0001>
module attributes {stable_mosaic.version = 11 : i64} {
  func.func @_axial_attn_kernel(%arg0: i32, %arg1: memref<2x8x128xf32, #tpu.memory_space<vmem>>, %arg2: memref<2x8x128xf32, #tpu.memory_space<vmem>>, %arg3: memref<2x8x128xf32, #tpu.memory_space<vmem>>, %arg4: memref<2x8x128xf32, #tpu.memory_space<vmem>>) attributes {dimension_semantics = [#tpu.dimension_semantics<parallel>], iteration_bounds = array<i64: 4>, scalar_prefetch = 0 : i64, scratch_operands = 0 : i64, tpu.core_type = #tpu.core_type<tc>, window_params = [{transform_indices = @transform_0, window_bounds = array<i64: 2, 8, 128>}, {transform_indices = @transform_1, window_bounds = array<i64: 2, 8, 128>}, {transform_indices = @transform_2, window_bounds = array<i64: 2, 8, 128>}, {transform_indices = @transform_3, window_bounds = array<i64: 2, 8, 128>}]} {
    %c0 = arith.constant 0 : index
    %c0_0 = arith.constant 0 : index
    %c0_1 = arith.constant 0 : index
    %0 = vector.load %arg1[%c0, %c0_0, %c0_1] : memref<2x8x128xf32, #tpu.memory_space<vmem>>, vector<2x8x128xf32>
    %c0_2 = arith.constant 0 : index
    %c0_3 = arith.constant 0 : index
    %c0_4 = arith.constant 0 : index
    %1 = vector.load %arg2[%c0_2, %c0_3, %c0_4] : memref<2x8x128xf32, #tpu.memory_space<vmem>>, vector<2x8x128xf32>
    %c0_5 = arith.constant 0 : index
    %c0_6 = arith.constant 0 : index
    %c0_7 = arith.constant 0 : index
    %2 = vector.load %arg3[%c0_5, %c0_6, %c0_7] : memref<2x8x128xf32, #tpu.memory_space<vmem>>, vector<2x8x128xf32>
    %3 = vector.extract_strided_slice %0 {offsets = [0, 0, 0], sizes = [2, 8, 32], strides = [1, 1, 1]} : vector<2x8x128xf32> to vector<2x8x32xf32>
    %4 = vector.extract_strided_slice %1 {offsets = [0, 0, 0], sizes = [2, 8, 32], strides = [1, 1, 1]} : vector<2x8x128xf32> to vector<2x8x32xf32>
    %5 = vector.extract_strided_slice %2 {offsets = [0, 0, 0], sizes = [2, 8, 32], strides = [1, 1, 1]} : vector<2x8x128xf32> to vector<2x8x32xf32>
    "tpu.trace_start"() <{level = 10 : i32, message = "bld,bmd->blm"}> : () -> ()
    %cst = arith.constant dense<0.000000e+00> : vector<2x8x8xf32>
    %6 = tpu.matmul %3, %4, %cst {dimension_numbers = #tpu.dot_dimension_numbers<[2], [2], [1], [1], [0, 0, 0, 1, 1, 1], [0], [0]>} : vector<2x8x32xf32>, vector<2x8x32xf32>, vector<2x8x8xf32> -> vector<2x8x8xf32>
    "tpu.trace_stop"() : () -> ()
    %cst_8 = arith.constant 0.176776692 : f32
    %7 = vector.broadcast %cst_8 : f32 to vector<2x8x8xf32>
    %8 = arith.mulf %6, %7 : vector<2x8x8xf32>
    %cst_9 = arith.constant dense<0xFF800000> : vector<2x8xf32>
    %9 = vector.multi_reduction <maximumf>, %8, %cst_9 [2] : vector<2x8x8xf32> to vector<2x8xf32>
    %10 = vector.shape_cast %9 : vector<2x8xf32> to vector<2x8x1xf32>
    %11 = vector.broadcast %10 : vector<2x8x1xf32> to vector<2x8x8xf32>
    %12 = arith.subf %8, %11 : vector<2x8x8xf32>
    %13 = math.exp %12 : vector<2x8x8xf32>
    %cst_10 = arith.constant dense<0.000000e+00> : vector<2x8xf32>
    %14 = vector.multi_reduction <add>, %13, %cst_10 [2] : vector<2x8x8xf32> to vector<2x8xf32>
    %15 = vector.shape_cast %14 : vector<2x8xf32> to vector<2x8x1xf32>
    "tpu.trace_start"() <{level = 10 : i32, message = "blm,bmd->bld"}> : () -> ()
    %cst_11 = arith.constant dense<0.000000e+00> : vector<2x8x32xf32>
    %16 = tpu.matmul %13, %5, %cst_11 {dimension_numbers = #tpu.dot_dimension_numbers<[2], [1], [1], [2], [0, 0, 0, 1, 1, 2], [0], [0]>} : vector<2x8x8xf32>, vector<2x8x32xf32>, vector<2x8x32xf32> -> vector<2x8x32xf32>
    "tpu.trace_stop"() : () -> ()
    %17 = vector.broadcast %15 : vector<2x8x1xf32> to vector<2x8x32xf32>
    %18 = arith.divf %16, %17 : vector<2x8x32xf32>
    %19 = vector.extract_strided_slice %0 {offsets = [0, 0, 32], sizes = [2, 8, 32], strides = [1, 1, 1]} : vector<2x8x128xf32> to vector<2x8x32xf32>
    %20 = vector.extract_strided_slice %1 {offsets = [0, 0, 32], sizes = [2, 8, 32], strides = [1, 1, 1]} : vector<2x8x128xf32> to vector<2x8x32xf32>
    %21 = vector.extract_strided_slice %2 {offsets = [0, 0, 32], sizes = [2, 8, 32], strides = [1, 1, 1]} : vector<2x8x128xf32> to vector<2x8x32xf32>
    "tpu.trace_start"() <{level = 10 : i32, message = "bld,bmd->blm"}> : () -> ()
    %cst_12 = arith.constant dense<0.000000e+00> : vector<2x8x8xf32>
    %22 = tpu.matmul %19, %20, %cst_12 {dimension_numbers = #tpu.dot_dimension_numbers<[2], [2], [1], [1], [0, 0, 0, 1, 1, 1], [0], [0]>} : vector<2x8x32xf32>, vector<2x8x32xf32>, vector<2x8x8xf32> -> vector<2x8x8xf32>
    "tpu.trace_stop"() : () -> ()
    %cst_13 = arith.constant 0.176776692 : f32
    %23 = vector.broadcast %cst_13 : f32 to vector<2x8x8xf32>
    %24 = arith.mulf %22, %23 : vector<2x8x8xf32>
    %cst_14 = arith.constant dense<0xFF800000> : vector<2x8xf32>
    %25 = vector.multi_reduction <maximumf>, %24, %cst_14 [2] : vector<2x8x8xf32> to vector<2x8xf32>
    %26 = vector.shape_cast %25 : vector<2x8xf32> to vector<2x8x1xf32>
    %27 = vector.broadcast %26 : vector<2x8x1xf32> to vector<2x8x8xf32>
    %28 = arith.subf %24, %27 : vector<2x8x8xf32>
    %29 = math.exp %28 : vector<2x8x8xf32>
    %cst_15 = arith.constant dense<0.000000e+00> : vector<2x8xf32>
    %30 = vector.multi_reduction <add>, %29, %cst_15 [2] : vector<2x8x8xf32> to vector<2x8xf32>
    %31 = vector.shape_cast %30 : vector<2x8xf32> to vector<2x8x1xf32>
    "tpu.trace_start"() <{level = 10 : i32, message = "blm,bmd->bld"}> : () -> ()
    %cst_16 = arith.constant dense<0.000000e+00> : vector<2x8x32xf32>
    %32 = tpu.matmul %29, %21, %cst_16 {dimension_numbers = #tpu.dot_dimension_numbers<[2], [1], [1], [2], [0, 0, 0, 1, 1, 2], [0], [0]>} : vector<2x8x8xf32>, vector<2x8x32xf32>, vector<2x8x32xf32> -> vector<2x8x32xf32>
    "tpu.trace_stop"() : () -> ()
    %33 = vector.broadcast %31 : vector<2x8x1xf32> to vector<2x8x32xf32>
    %34 = arith.divf %32, %33 : vector<2x8x32xf32>
    %35 = vector.extract_strided_slice %0 {offsets = [0, 0, 64], sizes = [2, 8, 32], strides = [1, 1, 1]} : vector<2x8x128xf32> to vector<2x8x32xf32>
    %36 = vector.extract_strided_slice %1 {offsets = [0, 0, 64], sizes = [2, 8, 32], strides = [1, 1, 1]} : vector<2x8x128xf32> to vector<2x8x32xf32>
    %37 = vector.extract_strided_slice %2 {offsets = [0, 0, 64], sizes = [2, 8, 32], strides = [1, 1, 1]} : vector<2x8x128xf32> to vector<2x8x32xf32>
    "tpu.trace_start"() <{level = 10 : i32, message = "bld,bmd->blm"}> : () -> ()
    %cst_17 = arith.constant dense<0.000000e+00> : vector<2x8x8xf32>
    %38 = tpu.matmul %35, %36, %cst_17 {dimension_numbers = #tpu.dot_dimension_numbers<[2], [2], [1], [1], [0, 0, 0, 1, 1, 1], [0], [0]>} : vector<2x8x32xf32>, vector<2x8x32xf32>, vector<2x8x8xf32> -> vector<2x8x8xf32>
    "tpu.trace_stop"() : () -> ()
    %cst_18 = arith.constant 0.176776692 : f32
    %39 = vector.broadcast %cst_18 : f32 to vector<2x8x8xf32>
    %40 = arith.mulf %38, %39 : vector<2x8x8xf32>
    %cst_19 = arith.constant dense<0xFF800000> : vector<2x8xf32>
    %41 = vector.multi_reduction <maximumf>, %40, %cst_19 [2] : vector<2x8x8xf32> to vector<2x8xf32>
    %42 = vector.shape_cast %41 : vector<2x8xf32> to vector<2x8x1xf32>
    %43 = vector.broadcast %42 : vector<2x8x1xf32> to vector<2x8x8xf32>
    %44 = arith.subf %40, %43 : vector<2x8x8xf32>
    %45 = math.exp %44 : vector<2x8x8xf32>
    %cst_20 = arith.constant dense<0.000000e+00> : vector<2x8xf32>
    %46 = vector.multi_reduction <add>, %45, %cst_20 [2] : vector<2x8x8xf32> to vector<2x8xf32>
    %47 = vector.shape_cast %46 : vector<2x8xf32> to vector<2x8x1xf32>
    "tpu.trace_start"() <{level = 10 : i32, message = "blm,bmd->bld"}> : () -> ()
    %cst_21 = arith.constant dense<0.000000e+00> : vector<2x8x32xf32>
    %48 = tpu.matmul %45, %37, %cst_21 {dimension_numbers = #tpu.dot_dimension_numbers<[2], [1], [1], [2], [0, 0, 0, 1, 1, 2], [0], [0]>} : vector<2x8x8xf32>, vector<2x8x32xf32>, vector<2x8x32xf32> -> vector<2x8x32xf32>
    "tpu.trace_stop"() : () -> ()
    %49 = vector.broadcast %47 : vector<2x8x1xf32> to vector<2x8x32xf32>
    %50 = arith.divf %48, %49 : vector<2x8x32xf32>
    %51 = vector.extract_strided_slice %0 {offsets = [0, 0, 96], sizes = [2, 8, 32], strides = [1, 1, 1]} : vector<2x8x128xf32> to vector<2x8x32xf32>
    %52 = vector.extract_strided_slice %1 {offsets = [0, 0, 96], sizes = [2, 8, 32], strides = [1, 1, 1]} : vector<2x8x128xf32> to vector<2x8x32xf32>
    %53 = vector.extract_strided_slice %2 {offsets = [0, 0, 96], sizes = [2, 8, 32], strides = [1, 1, 1]} : vector<2x8x128xf32> to vector<2x8x32xf32>
    "tpu.trace_start"() <{level = 10 : i32, message = "bld,bmd->blm"}> : () -> ()
    %cst_22 = arith.constant dense<0.000000e+00> : vector<2x8x8xf32>
    %54 = tpu.matmul %51, %52, %cst_22 {dimension_numbers = #tpu.dot_dimension_numbers<[2], [2], [1], [1], [0, 0, 0, 1, 1, 1], [0], [0]>} : vector<2x8x32xf32>, vector<2x8x32xf32>, vector<2x8x8xf32> -> vector<2x8x8xf32>
    "tpu.trace_stop"() : () -> ()
    %cst_23 = arith.constant 0.176776692 : f32
    %55 = vector.broadcast %cst_23 : f32 to vector<2x8x8xf32>
    %56 = arith.mulf %54, %55 : vector<2x8x8xf32>
    %cst_24 = arith.constant dense<0xFF800000> : vector<2x8xf32>
    %57 = vector.multi_reduction <maximumf>, %56, %cst_24 [2] : vector<2x8x8xf32> to vector<2x8xf32>
    %58 = vector.shape_cast %57 : vector<2x8xf32> to vector<2x8x1xf32>
    %59 = vector.broadcast %58 : vector<2x8x1xf32> to vector<2x8x8xf32>
    %60 = arith.subf %56, %59 : vector<2x8x8xf32>
    %61 = math.exp %60 : vector<2x8x8xf32>
    %cst_25 = arith.constant dense<0.000000e+00> : vector<2x8xf32>
    %62 = vector.multi_reduction <add>, %61, %cst_25 [2] : vector<2x8x8xf32> to vector<2x8xf32>
    %63 = vector.shape_cast %62 : vector<2x8xf32> to vector<2x8x1xf32>
    "tpu.trace_start"() <{level = 10 : i32, message = "blm,bmd->bld"}> : () -> ()
    %cst_26 = arith.constant dense<0.000000e+00> : vector<2x8x32xf32>
    %64 = tpu.matmul %61, %53, %cst_26 {dimension_numbers = #tpu.dot_dimension_numbers<[2], [1], [1], [2], [0, 0, 0, 1, 1, 2], [0], [0]>} : vector<2x8x8xf32>, vector<2x8x32xf32>, vector<2x8x32xf32> -> vector<2x8x32xf32>
    "tpu.trace_stop"() : () -> ()
    %65 = vector.broadcast %63 : vector<2x8x1xf32> to vector<2x8x32xf32>
    %66 = arith.divf %64, %65 : vector<2x8x32xf32>
    %67 = tpu.concatenate %18, %34, %50, %66 in 2 : vector<2x8x32xf32>, vector<2x8x32xf32>, vector<2x8x32xf32>, vector<2x8x32xf32> -> vector<2x8x128xf32>
    %c0_27 = arith.constant 0 : index
    %c0_28 = arith.constant 0 : index
    %c0_29 = arith.constant 0 : index
    %68 = vector.load %arg4[%c0_27, %c0_28, %c0_29] : memref<2x8x128xf32, #tpu.memory_space<vmem>>, vector<2x8x128xf32>
    tpu.vector_store %arg4[%c0_27, %c0_28, %c0_29], %67 {strides = array<i32>} : memref<2x8x128xf32, #tpu.memory_space<vmem>>, vector<2x8x128xf32>,
    return
  }
  func.func @transform_0(%arg0: i32) -> (i32, i32, i32) {
    %c0_i32 = arith.constant 0 : i32
    %c0_i32_0 = arith.constant 0 : i32
    %c0_i32_1 = arith.constant 0 : i32
    return %arg0, %c0_i32, %c0_i32_0 : i32, i32, i32
  }
  func.func @transform_1(%arg0: i32) -> (i32, i32, i32) {
    %c0_i32 = arith.constant 0 : i32
    %c0_i32_0 = arith.constant 0 : i32
    %c0_i32_1 = arith.constant 0 : i32
    return %arg0, %c0_i32, %c0_i32_0 : i32, i32, i32
  }
  func.func @transform_2(%arg0: i32) -> (i32, i32, i32) {
    %c0_i32 = arith.constant 0 : i32
    %c0_i32_0 = arith.constant 0 : i32
    %c0_i32_1 = arith.constant 0 : i32
    return %arg0, %c0_i32, %c0_i32_0 : i32, i32, i32
  }
  func.func @transform_3(%arg0: i32) -> (i32, i32, i32) {
    %c0_i32 = arith.constant 0 : i32
    %c0_i32_0 = arith.constant 0 : i32
    %c0_i32_1 = arith.constant 0 : i32
    return %arg0, %c0_i32, %c0_i32_0 : i32, i32, i32
  }
}

</mosaic_0001>

<bundles_post_ra>
// kernel: tpu_custom_call.1
= control target key start
LH: loop header
LB: loop body
LE: loop exit
PB: predicated region body
PF: predicated region fallthrough
CT: control target
= control target key end

     0   :  { %s2658_s0 = inlined_call_operand.hbm [shape: f32[8,8,128], index: 0, kind: input, shape index: {}]   ;;  %s2659_s1 = inlined_call_operand.hbm [shape: f32[8,8,128], index: 1, kind: input, shape index: {}]   ;;  %s2660_s2 = inlined_call_operand.hbm [shape: f32[8,8,128], index: 2, kind: input, shape index: {}]   ;;  %s2661_s3 = inlined_call_operand.hbm [shape: f32[8,8,128], index: 3, kind: output, shape index: {}]  }
   0x1   :  { %2668 = sst [smem:[#allocation12_spill]] %s2658_s0 }
   0x2   :  { %8 = vsyncpa [#allocation3], 0 }
   0x3   :  { %10 = vsyncpa [#allocation3 + $0x1], 0 }
   0x4   :  { %11 = vsyncpa [#allocation6], 0 }
   0x5   :  { %13 = vsyncpa [#allocation6 + $0x1], 0 }
   0x6   :  { %14 = vsyncpa [#allocation4], 0 }
   0x7   :  { %16 = vsyncpa [#allocation4 + $0x1], 0  ;;  %s2216_s12 = smov 0   ;;  %s2218_s13 = smov 0  }
   0x8   :  { %s2220_s14 = smov 0   ;;  %s2222_s15 = smov 0  }
   0x9 LB: > { %s2237_s16 = sadd.s32 4294967295, %s2181_s15   ;;  %s1762_s17 = sadd.s32 4294967294, %s2181_s15   ;;  %s2181_s15 = sphi %s2222_s15, %s2686_s15   ;;  %s2177_s14 = sphi %s2220_s14, %s2685_s14   ;;  %s2173_s13 = sphi %s2218_s13, %s2684_s13   ;;  %s2169_s12 = sphi %s2216_s12, %s2683_s12  }
   0xa   : > { %s2241_s18 = sadd.s32 1, %s2181_s15   ;;  %s29_s19 = sadd.s32 1, %s2177_s14 }
   0xb   : > { %s26_s20 = ssub.s32 %s2181_s15, %s2241_s18  ;;  %p36_p0 = scmp.ne.s32.totalorder %s2177_s14, %s2173_s13 }
   0xc   : > { %p27_p1 = scmp.eq.s32.totalorder %s26_s20, 0  ;;  %p37_p2 = scmp.eq.s32.totalorder %s2181_s15, 0 }
   0xd   : > { %p42_p3 = scmp.ne.s32.totalorder %s2173_s13, %s2169_s12  ;;  %p43_p4 = scmp.eq.s32.totalorder %s2237_s16, 0 }
   0xe   : > { %s2253_s21 = scalar_select %p27_p1, %s2177_s14, %s29_s19  }
   0xf   : > { %p38_p5 = por %p37_p2, %p36_p0  ;;  %p2255_p6 = por %p43_p4, %p42_p3 }
  0x10   : > { %p118_p7 = scmp.eq.s32.totalorder %s2237_s16, 3  ;;  %p124_p8 = scmp.eq.s32.totalorder %s1762_s17, 3 }
  0x11   : > { %s2669_s22 = scalar_select %p2255_p6, 1, 0 }
  0x12   : > { %p1946_p9 = scmp.lt.s32.totalorder %s2181_s15, 4  ;;  %p2261_p10 = por %p118_p7, %p36_p0 }
  0x13   : > { %p2265_p11 = por %p124_p8, %p42_p3  ;;  %s144_s25 = sand.u32 1, %s2177_s14  }
  0x14   : > { %s2670_s23 = scalar_select %p2261_p10, 1, 0 }
  0x15   : > { %s2671_s24 = scalar_select %p2265_p11, 1, 0 }
  0x16   : > { %s2271_s26 = sshll.u32 %s2181_s15, 8  ;;  %s2275_s27 = sshll.u32 %s144_s25, 4 }
  0x17   : > { %p2277_p12 = pnand %p1946_p9, %p38_p5  ;;  %s165_s29 = sand.u32 1, %s2181_s15  }
  0x18   : > { %s2286_s5 = scalar_lea.hbm %s2659_s1, %s2271_s26  ;;  %s169_s6 = scalar_lea.vmem [#allocation5], %s2275_s27 }
  0x19   : > { %s176_s7 = sshll.u32 %s169_s6, 4  ;;  %s2292_s8 = scalar_lea.sflag [#allocation6], %s165_s29  ;;  %s2289_s7 = int_to_ptr.vmem [resolvable:$true] %s176_s7 }
  0x1a   : > { %s2021_s9 = scalar_lea.hbm %s2286_s5, 256  ;;  %p2298_p1 = pneg %p2277_p12 }
  0x1b   : > { %p2022_p0 = scmp.ne.s32.totalorder %s2286_s5, %s2021_s9  ;;  %s2026_s19 = scalar_lea.hbm %s2659_s1, 1024 }
  0x1c   : > { %p2027_p4 = scmp.lt.u32.totalorder %s2286_s5, %s2659_s1  ;;  %p2028_p5 = scmp.lt.u32.totalorder %s2026_s19, %s2021_s9 }
  0x1d   : > { %p2024_p2 = pnand %p2298_p1, %p2022_p0  ;;  %p2030_p8 = scmp.lt.u32.totalorder %s2021_s9, %s2286_s5 }
  0x1e   : > { %p2029_p7 = por %p2028_p5, %p2027_p4 }
  0x1f   : > { %p2025_p3 = pneg %p2024_p2 }
  0x20   : > { %p2031_p9 = por %p2030_p8, %p2029_p7 }
  0x22   : > { %p2032_p13 = pnand %p2031_p9, %p2025_p3 }
  0x24   : > { %2035 = shalt.err (!%p2032_p13)
}
  0x25   : > { %s2036_s29 = scalar_lea.vmem %s2289_s7, 256  ;;  %s2183_s4 = smov [#allocation5]  }
  0x26   : > { %p2037_p0 = scmp.ne.s32.totalorder %s2289_s7, %s2036_s29  ;;  %s2041_s6 = sshll.u32 %s2183_s4, 4  ;;  %s2042_s6 = int_to_ptr.vmem [resolvable:$false] %s2041_s6 }
  0x27   : > { %s2043_s11 = scalar_lea.vmem %s2042_s6, 512  ;;  %p2044_p10 = scmp.lt.s32.totalorder %s2289_s7, %s2042_s6 }
  0x28   : > { %p2039_p2 = pnand %p2037_p0, %p2298_p1  ;;  %p2045_p6 = scmp.lt.s32.totalorder %s2043_s11, %s2036_s29 }
  0x2a   : > { %p2040_p11 = pneg %p2039_p2  ;;  %p2046_p4 = por %p2045_p6, %p2044_p10 }
  0x2c   : > { %p2047_p5 = pnand %p2046_p4, %p2040_p11 }
  0x2e   : > { %2050 = shalt.err (!%p2047_p5)
}
  0x2f   : > { %s2664_s9 = smov 128   ;;  %s2666_s17 = smov 8  }
  0x30   : > { %1938 = dma.hbm_to_vmem [thread:$0]  (!%p2277_p12), %s2286_s5, 256, %s2289_s7, %s2292_s8, %s2664_s9, %s2664_s9, %s2666_s17  }
  0x31   : > { %p205_p6 = scmp.lt.s32.totalorder %s2181_s15, 5  ;;  %s2674_s0 = sld [smem:[#allocation12_spill]] }
  0x32   : > { %p2675_p10 = scmp.ge.s32.totalorder %s2181_s15, 1  ;;  %s148_s4 = scalar_lea.vmem [#allocation2], %s2275_s27 }
  0x33   : > { %s155_s6 = sshll.u32 %s148_s4, 4  ;;  %s2343_s5 = scalar_lea.sflag [#allocation3], %s144_s25  ;;  %s2339_s6 = int_to_ptr.vmem [resolvable:$true] %s155_s6 }
  0x34   : > { %p2334_p11 = pnand %p2675_p10, %p205_p6 }
  0x36   : > { %s2676_s29 = scalar_select %p2334_p11, 1, 0 }
  0x37   : > { %s2330_s30 = scalar_lea.hbm %s2674_s0, %s2271_s26  ;;  %s2056_s20 = scalar_lea.hbm %s2674_s0, 1024 }
  0x38   : > { %s2051_s7 = scalar_lea.hbm %s2330_s30, 256  ;;  %p2057_p8 = scmp.lt.u32.totalorder %s2330_s30, %s2674_s0 }
  0x39   : > { %p2052_p13 = scmp.ne.s32.totalorder %s2330_s30, %s2051_s7  ;;  %p2058_p9 = scmp.lt.u32.totalorder %s2056_s20, %s2051_s7 }
  0x3a   : > { %p2060_p2 = scmp.lt.u32.totalorder %s2051_s7, %s2330_s30 }
  0x3b   : > { %p2054_p3 = pnand %p2052_p13, %p2298_p1  ;;  %p2059_p0 = por %p2058_p9, %p2057_p8 }
  0x3d   : > { %p2055_p7 = pneg %p2054_p3  ;;  %p2061_p4 = por %p2060_p2, %p2059_p0 }
  0x3f   : > { %p2062_p5 = pnand %p2061_p4, %p2055_p7 }
  0x41   : > { %2065 = shalt.err (!%p2062_p5)
}
  0x42   : > { %s2066_s25 = scalar_lea.vmem %s2339_s6, 256  ;;  %s2186_s4 = smov [#allocation2]  }
  0x43   : > { %p2067_p6 = scmp.ne.s32.totalorder %s2339_s6, %s2066_s25  ;;  %s2071_s11 = sshll.u32 %s2186_s4, 4  ;;  %s2072_s11 = int_to_ptr.vmem [resolvable:$false] %s2071_s11 }
  0x44   : > { %s2073_s9 = scalar_lea.vmem %s2072_s11, 512  ;;  %p2074_p3 = scmp.lt.s32.totalorder %s2339_s6, %s2072_s11 }
  0x45   : > { %p2069_p10 = pnand %p2067_p6, %p2298_p1  ;;  %p2075_p11 = scmp.lt.s32.totalorder %s2073_s9, %s2066_s25 }
  0x47   : > { %p2070_p13 = pneg %p2069_p10  ;;  %p2076_p8 = por %p2075_p11, %p2074_p3 }
  0x49   : > { %p2077_p9 = pnand %p2076_p8, %p2070_p13 }
  0x4b   : > { %2080 = shalt.err (!%p2077_p9)
}
  0x4c   : > { %s2677_s17 = smov 8   ;;  %s2678_s7 = smov 128  }
  0x4d   : > { %1935 = dma.hbm_to_vmem [thread:$0]  (!%p2277_p12), %s2330_s30, 256, %s2339_s6, %s2343_s5, %s2678_s7, %s2678_s7, %s2677_s17  }
  0x4e   : > { %s2374_s4 = scalar_lea.hbm %s2660_s2, %s2271_s26  ;;  %s190_s25 = scalar_lea.vmem [#allocation7], %s2275_s27 }
  0x4f   : > { %s197_s11 = sshll.u32 %s190_s25, 4  ;;  %s2081_s9 = scalar_lea.hbm %s2374_s4, 256  ;;  %s2377_s11 = int_to_ptr.vmem [resolvable:$true] %s197_s11 }
  0x50   : > { %p2082_p11 = scmp.ne.s32.totalorder %s2374_s4, %s2081_s9  ;;  %s2086_s6 = scalar_lea.hbm %s2660_s2, 1024 }
  0x51   : > { %p2087_p2 = scmp.lt.u32.totalorder %s2374_s4, %s2660_s2  ;;  %p2088_p4 = scmp.lt.u32.totalorder %s2086_s6, %s2081_s9 }
  0x52   : > { %p2084_p7 = pnand %p2082_p11, %p2298_p1  ;;  %p2090_p6 = scmp.lt.u32.totalorder %s2081_s9, %s2374_s4 }
  0x53   : > { %p2089_p5 = por %p2088_p4, %p2087_p2 }
  0x54   : > { %p2085_p0 = pneg %p2084_p7 }
  0x55   : > { %p2091_p10 = por %p2090_p6, %p2089_p5 }
  0x57   : > { %p2092_p13 = pnand %p2091_p10, %p2085_p0 }
  0x59   : > { %2095 = shalt.err (!%p2092_p13)
}
  0x5a   : > { %s2096_s27 = scalar_lea.vmem %s2377_s11, 256  ;;  %s2187_s0 = smov [#allocation7]  }
  0x5b   : > { %p2097_p3 = scmp.ne.s32.totalorder %s2377_s11, %s2096_s27  ;;  %s2101_s19 = sshll.u32 %s2187_s0, 4  ;;  %s2102_s19 = int_to_ptr.vmem [resolvable:$false] %s2101_s19 }
  0x5c   : > { %s2103_s20 = scalar_lea.vmem %s2102_s19, 512  ;;  %p2104_p11 = scmp.lt.s32.totalorder %s2377_s11, %s2102_s19 }
  0x5d   : > { %p2099_p8 = pnand %p2097_p3, %p2298_p1  ;;  %p2105_p7 = scmp.lt.s32.totalorder %s2103_s20, %s2096_s27 }
  0x5f   : > { %p2100_p9 = pneg %p2099_p8  ;;  %p2106_p2 = por %p2105_p7, %p2104_p11 }
  0x61   : > { %p2107_p4 = pnand %p2106_p2, %p2100_p9 }
  0x63   : > { %2110 = shalt.err (!%p2107_p4)
}
  0x64   : > { %1941 = dma.hbm_to_vmem [thread:$0]  (!%p2277_p12), %s2374_s4, 256, %s2377_s11, %s2292_s8, %s2678_s7, %s2678_s7, %s2677_s17  }
  0x65   : > { %p2679_p1 = scmp.ne.s32.totalorder %s2676_s29, 0 }
  0x66   : > { %s2407_s10 = sand.u32 (!%p2679_p1), 1, %s2173_s13   ;;  %p2680_p0 = scmp.ne.s32.totalorder (!%p2679_p1), %s2669_s22, 0 }
  0x67   : > { %209 = sbr.rel (%p2679_p1) target bundleno = 1969 (0x7b1), region = 32  ;;  %s2410_s25 = sshll.u32 (!%p2679_p1), %s2407_s10, 4 }
  0x68   : > { %s212_s28 = scalar_lea.sflag (!%p2679_p1), [#allocation3], %s2407_s10  ;;  %s215_s9 = scalar_lea.vmem (!%p2679_p1), [#allocation2], %s2410_s25 }
  0x6e   : > { %2156 = dma.done.wait (%p2680_p0), %s212_s28, 256  }
  0x6f   : > { %2158 = vsyncadd (%p2680_p0), %s212_s28, 4294967040  ;;  %s220_s8 = sand.u32 1, %s2237_s16   ;;  %s224_s17 = scalar_lea.vmem [#allocation5], %s2410_s25 }
  0x70   : > { %s221_s29 = scalar_lea.sflag [#allocation6], %s220_s8 }
  0x71   : > { %2160 = dma.done.wait (%p2680_p0), %s221_s29, 512  }
  0x72   : > { %2162 = vsyncadd (%p2680_p0), %s221_s29, 4294966784  ;;  %v2188_v0 = vmov 0.0   ;;  %vm2189_vm0 = vmmov 0   ;;  %vm276_vm1 = vcmask 261120   ;;  %v2430_v1 = vld [vmem:[%s224_s17] sm:$0xff]  ;;  %v2432_v2 = vld [vmem:[%s224_s17 + $0x8] sm:$0xff] }
  0x73   : > { %1844 = vmatprep.subr.mxu0 %v2188_v0  ;;  %1846 = vmatprep.mubr.msk.f32.mxu0 %vm2189_vm0, %v2188_v0  ;;  %v2436_v3 = vld [vmem:[%s215_s9] sm:$0xff]  ;;  %v2440_v4 = vld [vmem:[%s215_s9 + $0x8] sm:$0xff]  ;;  %s2190_s22 = smov 96   ;;  %vm431_vm2 = vcmask 64512   ;;  %s233_s7 = scalar_lea.vmem [#allocation7], %s2410_s25  ;;  %vm1627_vm3 = vcmask 785408  }
  0x74   : > { %1849 = vmatprep.subr.mxu1 %v2188_v0  ;;  %1851 = vmatprep.mubr.msk.f32.mxu1 %vm2189_vm0, %v2188_v0  ;;  %v2461_v13 = vld [vmem:[%s233_s7] sm:$0xff]  ;;  %v2464_v14 = vld [vmem:[%s233_s7 + $0x8] sm:$0xff]  ;;  %s2191_s4 = smov 64   ;;  %s2192_s11 = smov 32   ;;  %vm1624_vm4 = vcmask 523264  }
  0x75   : > { %1845 = vmatpush3.xpose.msk.msra.mxu0 %vm276_vm1, %v2430_v1  ;;  %1850 = vmatpush3.xpose.msk.msra.mxu1 %vm276_vm1, %v2432_v2  ;;  %s265_s30 = scalar_lea.vmem [#allocation8], %s2410_s25  ;;  %s1811_s5 = sshll.u32 %s2237_s16, 8 }
  0x76   : > { %1854 = vmatprep.subr.mxu0 %v2188_v0  ;;  %1859 = vmatprep.subr.mxu1 %v2188_v0  ;;  %s1646_s6 = sshll.u32 %s265_s30, 4  ;;  %s2614_s0 = scalar_lea.hbm %s2661_s3, %s1811_s5  ;;  %s2609_s6 = int_to_ptr.vmem [resolvable:$true] %s1646_s6 }
  0x77   : > { %602 = vrot.lane.b32.xlu1 %v2430_v1, %s2190_s22  ;;  %s1633_s16 = scalar_lea.sflag [#allocation4], %s2407_s10  ;;  %s2111_s19 = scalar_lea.vmem %s2609_s6, 256 }
  0x78   : > { %1847 = vmatmul.mubr.msk.f32.vlgmr.msra.gmra.mrb[0].mxu0 %vm276_vm1, %v2436_v3  ;;  %1852 = vmatmul.mubr.msk.f32.vlgmr.msra.gmra.mrb[0].mxu1 %vm276_vm1, %v2440_v4  ;;  %p2112_p12 = scmp.ne.s32.totalorder %s2609_s6, %s2111_s19  ;;  %p2681_p5 = scmp.ne.s32.totalorder %s2670_s23, 0 }
  0x79   : > { %1856 = vmatprep.mubr.msk.f32.mxu0 %vm2189_vm0, %v2188_v0  ;;  %1861 = vmatprep.mubr.msk.f32.mxu1 %vm2189_vm0, %v2188_v0  ;;  %s2193_s20 = smov [#allocation8]  }
  0x7a   : > { %1855 = vmatpush3.msra.mxu0 %v2461_v13  ;;  %1860 = vmatpush3.msra.mxu1 %v2464_v14  ;;  %p2113_p6 = pnand %p2112_p12, %p2681_p5  ;;  %s2115_s25 = sshll.u32 %s2193_s20, 4  ;;  %s2116_s25 = int_to_ptr.vmem [resolvable:$false] %s2115_s25 }
  0x7b   : > { %680 = vrot.lane.b32.xlu1 %v2432_v2, %s2190_s22  ;;  %1864 = vmatprep.subr.mxu0 %v2188_v0  ;;  %s2117_s28 = scalar_lea.vmem %s2116_s25, 512  ;;  %p2118_p13 = scmp.lt.s32.totalorder %s2609_s6, %s2116_s25 }
  0x7c   : > { %1869 = vmatprep.subr.mxu1 %v2188_v0  ;;  %p2114_p10 = pneg %p2113_p6  ;;  %p2119_p3 = scmp.lt.s32.totalorder %s2117_s28, %s2111_s19 }
  0x7e   : > { %p2120_p8 = por %p2119_p3, %p2118_p13 }
  0x7f   : > { %678 = vrot.lane.b32.xlu1 %v2440_v4, %s2190_s22 }
  0x80   : > { %p2121_p9 = pnand %p2120_p8, %p2114_p10 }
  0x83   : > { %777 = vrot.lane.b32.xlu1 %v2461_v13, %s2190_s22 }
  0xe9   : > { %v603_v21 = vpop.permute.xlu1 %602 }
  0xed   : > { %v681_v23 = vpop.permute.xlu1 %680 }
  0xf1   : > { %v679_v26 = vpop.permute.xlu1 %678 }
  0xf5   : > { %v778_v27 = vpop.permute.xlu1 %777 }
 0x14b   : > { %v349_v5 = vpop.f32.mrb[0].mxu0  ;;  %v425_v6 = vpop.f32.mrb[0].mxu1 }
 0x14c   : > { %v429_v7 = vmul.f32 0.17677669, %v349_v5  ;;  %v1848_v8 = vpop.f32.mrb[1].mxu0  ;;  %v430_v9 = vmul.f32 0.17677669, %v425_v6  ;;  %v1853_v10 = vpop.f32.mrb[1].mxu1 }
 0x14e   : > { %v432_v11 = vsel %vm431_vm2, %v429_v7, -inf  ;;  %v435_v12 = vsel %vm431_vm2, %v430_v9, -inf }
 0x14f   : > { %433 = vmax.xlane.f32.xlu0 %v432_v11 }
 0x153   : > { %436 = vmax.xlane.f32.xlu0 %v435_v12 }
 0x169   : > { %600 = vrot.lane.b32.xlu0 %v2436_v3, %s2190_s22 }
 0x1dc   : > { %v434_v15 = vpop.xlane.xlu0 %433 }
 0x1dd   : > { %v438_v16 = vsub.f32 %v429_v7, %v434_v15 }
 0x1df   : > { %v440_v17 = vmul.f32 1.442695, %v438_v16 }
 0x1e0   : > { %v437_v18 = vpop.xlane.xlu0 %436 }
 0x1e1   : > { %1989 = vpow2.f32 %v440_v17  ;;  %v439_v19 = vsub.f32 %v430_v9, %v437_v18 }
 0x1e3   : > { %v442_v20 = vmul.f32 1.442695, %v439_v19 }
 0x1e4   : > { %v601_v24 = vpop.permute.xlu0 %600 }
 0x1e5   : > { %1991 = vpow2.f32 %v442_v20 }
 0x1eb   : > { %v2473_v22 = vpop.eup %1989 }
 0x1ec   : > { %1857 = vmatmul.mubr.msk.f32.vlgmr.msra.gmra.mrb[2].mxu0 %vm431_vm2, %v2473_v22 }
 0x1ed   : > { %1865 = vmatpush3.xpose.msk.msra.mxu0 %vm276_vm1, %v603_v21  ;;  %1866 = vmatprep.mubr.msk.f32.mxu0 %vm2189_vm0, %v2188_v0 }
 0x1ee   : > { %1874 = vmatprep.subr.mxu0 %v2188_v0 }
 0x1ef   : > { %v2481_v25 = vpop.eup %1991 }
 0x1f0   : > { %1862 = vmatmul.mubr.msk.f32.vlgmr.msra.gmra.mrb[2].mxu1 %vm431_vm2, %v2481_v25  ;;  %1867 = vmatmul.mubr.msk.f32.vlgmr.msra.gmra.mrb[4].mxu0 %vm276_vm1, %v601_v24 }
 0x1f1   : > { %1870 = vmatpush3.xpose.msk.msra.mxu1 %vm276_vm1, %v681_v23  ;;  %1871 = vmatprep.mubr.msk.f32.mxu1 %vm2189_vm0, %v2188_v0 }
 0x1f2   : > { %1879 = vmatprep.subr.mxu1 %v2188_v0  ;;  %1876 = vmatprep.mubr.msk.f32.mxu0 %vm2189_vm0, %v2188_v0 }
 0x1f3   : > { %1875 = vmatpush3.msra.mxu0 %v778_v27 }
 0x1f4   : > { %1872 = vmatmul.mubr.msk.f32.vlgmr.msra.gmra.mrb[4].mxu1 %vm276_vm1, %v679_v26  ;;  %1884 = vmatprep.subr.mxu0 %v2188_v0 }
 0x1f5   : > { %1881 = vmatprep.mubr.msk.f32.mxu1 %vm2189_vm0, %v2188_v0 }
 0x2bf   : > { %v2496_v28 = vpop.f32.mrb[2].mxu0 }
 0x2c0   : > { %v1858_v29 = vpop.f32.mrb[3].mxu0 }
 0x2c3   : > { %v2498_v30 = vpop.f32.mrb[2].mxu1  ;;  %v674_v31 = vpop.f32.mrb[4].mxu0 }
 0x2c4   : > { %v756_v32 = vmul.f32 0.17677669, %v674_v31  ;;  %v1863_v33 = vpop.f32.mrb[3].mxu1  ;;  %v1868_v34 = vpop.f32.mrb[5].mxu0 }
 0x2c6   : > { %v758_v35 = vsel %vm431_vm2, %v756_v32, -inf }
 0x2c7   : > { %v752_v36 = vpop.f32.mrb[4].mxu1  ;;  %759 = vmax.xlane.f32.xlu1 %v758_v35 }
 0x2c8   : > { %v757_v37 = vmul.f32 0.17677669, %v752_v36  ;;  %v1873_v38 = vpop.f32.mrb[5].mxu1 }
 0x2ca   : > { %v761_v39 = vsel %vm431_vm2, %v757_v37, -inf }
 0x2cb   : > { %762 = vmax.xlane.f32.xlu0 %v761_v39 }
 0x2d8   : > { %936 = vrot.lane.b32.xlu1 %v2430_v1, %s2191_s4 }
 0x2dc   : > { %1014 = vrot.lane.b32.xlu1 %v2432_v2, %s2191_s4 }
 0x2e0   : > { %934 = vrot.lane.b32.xlu1 %v2436_v3, %s2191_s4 }
 0x2e1   : > { %854 = vrot.lane.b32.xlu0 %v2464_v14, %s2190_s22 }
 0x2e4   : > { %1012 = vrot.lane.b32.xlu1 %v2440_v4, %s2191_s4 }
 0x2e5   : > { %1110 = vrot.lane.b32.xlu0 %v2461_v13, %s2191_s4 }
 0x2e8   : > { %1186 = vrot.lane.b32.xlu1 %v2464_v14, %s2191_s4 }
 0x2ec   : > { %1268 = vrot.lane.b32.xlu1 %v2430_v1, %s2192_s11 }
 0x354   : > { %v760_v40 = vpop.xlane.xlu1 %759 }
 0x355   : > { %v764_v41 = vsub.f32 %v756_v32, %v760_v40 }
 0x357   : > { %v766_v42 = vmul.f32 1.442695, %v764_v41 }
 0x358   : > { %v763_v43 = vpop.xlane.xlu0 %762  ;;  %v937_v44 = vpop.permute.xlu1 %936 }
 0x359   : > { %1993 = vpow2.f32 %v766_v42  ;;  %v765_v45 = vsub.f32 %v757_v37, %v763_v43 }
 0x35b   : > { %v768_v46 = vmul.f32 1.442695, %v765_v45 }
 0x35c   : > { %v855_v47 = vpop.permute.xlu0 %854  ;;  %v1015_v48 = vpop.permute.xlu1 %1014 }
 0x35d   : > { %1995 = vpow2.f32 %v768_v46  ;;  %1880 = vmatpush3.msra.mxu1 %v855_v47  ;;  %v444_v47 = vsel %vm431_vm2, %v2473_v22, 0.0 }
 0x35e   : > { %1889 = vmatprep.subr.mxu1 %v2188_v0 }
 0x360   : > { %v935_v50 = vpop.permute.xlu1 %934  ;;  %v1111_v54 = vpop.permute.xlu0 %1110 }
 0x363   : > { %v2519_v49 = vpop.eup %1993 }
 0x364   : > { %1877 = vmatmul.mubr.msk.f32.vlgmr.msra.gmra.mrb[6].mxu0 %vm431_vm2, %v2519_v49  ;;  %v1013_v52 = vpop.permute.xlu1 %1012 }
 0x365   : > { %1885 = vmatpush3.xpose.msk.msra.mxu0 %vm276_vm1, %v937_v44  ;;  %1886 = vmatprep.mubr.msk.f32.mxu0 %vm2189_vm0, %v2188_v0 }
 0x366   : > { %1894 = vmatprep.subr.mxu0 %v2188_v0 }
 0x367   : > { %v2527_v51 = vpop.eup %1995 }
 0x368   : > { %1882 = vmatmul.mubr.msk.f32.vlgmr.msra.gmra.mrb[6].mxu1 %vm431_vm2, %v2527_v51  ;;  %1887 = vmatmul.mubr.msk.f32.vlgmr.msra.gmra.mrb[8].mxu0 %vm276_vm1, %v935_v50  ;;  %v1187_v53 = vpop.permute.xlu1 %1186  ;;  %v773_v34 = vsel %vm431_vm2, %v2527_v51, 0.0 }
 0x369   : > { %1890 = vmatpush3.xpose.msk.msra.mxu1 %vm276_vm1, %v1015_v48  ;;  %1891 = vmatprep.mubr.msk.f32.mxu1 %vm2189_vm0, %v2188_v0  ;;  %v447_v48 = vsel %vm431_vm2, %v2481_v25, 0.0 }
 0x36a   : > { %1899 = vmatprep.subr.mxu1 %v2188_v0  ;;  %1896 = vmatprep.mubr.msk.f32.mxu0 %vm2189_vm0, %v2188_v0 }
 0x36b   : > { %1895 = vmatpush3.msra.mxu0 %v1111_v54 }
 0x36c   : > { %1892 = vmatmul.mubr.msk.f32.vlgmr.msra.gmra.mrb[8].mxu1 %vm276_vm1, %v1013_v52  ;;  %1904 = vmatprep.subr.mxu0 %v2188_v0  ;;  %v1269_v7 = vpop.permute.xlu1 %1268 }
 0x36d   : > { %1901 = vmatprep.mubr.msk.f32.mxu1 %vm2189_vm0, %v2188_v0  ;;  %1900 = vmatpush3.msra.mxu1 %v1187_v53 }
 0x36e   : > { %1909 = vmatprep.subr.mxu1 %v2188_v0 }
 0x437   : > { %v2543_v55 = vpop.f32.mrb[6].mxu0 }
 0x438   : > { %v1878_v56 = vpop.f32.mrb[7].mxu0 }
 0x43b   : > { %v2545_v57 = vpop.f32.mrb[6].mxu1  ;;  %v1008_v58 = vpop.f32.mrb[8].mxu0 }
 0x43c   : > { %v1090_v59 = vmul.f32 0.17677669, %v1008_v58  ;;  %v1883_v60 = vpop.f32.mrb[7].mxu1  ;;  %v1888_v61 = vpop.f32.mrb[9].mxu0 }
 0x43e   : > { %v1092_v62 = vsel %vm431_vm2, %v1090_v59, -inf }
 0x43f   : > { %v1086_v63 = vpop.f32.mrb[8].mxu1  ;;  %1093 = vmax.xlane.f32.xlu1 %v1092_v62 }
 0x440   : > { %v1091_v1 = vmul.f32 0.17677669, %v1086_v63  ;;  %v1893_v5 = vpop.f32.mrb[9].mxu1 }
 0x442   : > { %v1095_v6 = vsel %vm431_vm2, %v1091_v1, -inf }
 0x443   : > { %1096 = vmax.xlane.f32.xlu0 %v1095_v6 }
 0x450   : > { %1266 = vrot.lane.b32.xlu1 %v2436_v3, %s2192_s11 }
 0x459   : > { %1346 = vrot.lane.b32.xlu0 %v2432_v2, %s2192_s11 }
 0x45d   : > { %1344 = vrot.lane.b32.xlu0 %v2440_v4, %s2192_s11 }
 0x4cc   : > { %v1094_v8 = vpop.xlane.xlu1 %1093 }
 0x4cd   : > { %v1098_v9 = vsub.f32 %v1090_v59, %v1094_v8 }
 0x4cf   : > { %v1100_v10 = vmul.f32 1.442695, %v1098_v9 }
 0x4d0   : > { %v1097_v11 = vpop.xlane.xlu0 %1096  ;;  %v1267_v2 = vpop.permute.xlu1 %1266 }
 0x4d1   : > { %1997 = vpow2.f32 %v1100_v10  ;;  %v1099_v12 = vsub.f32 %v1091_v1, %v1097_v11 }
 0x4d3   : > { %v1102_v15 = vmul.f32 1.442695, %v1099_v12 }
 0x4d4   : > { %v1347_v17 = vpop.permute.xlu0 %1346 }
 0x4d5   : > { %1999 = vpow2.f32 %v1102_v15 }
 0x4d8   : > { %v1345_v4 = vpop.permute.xlu0 %1344 }
 0x4db   : > { %v1998_v16 = vpop.eup %1997 }
 0x4dc   : > { %1897 = vmatmul.mubr.msk.f32.vlgmr.msra.gmra.mrb[10].mxu0 %vm431_vm2, %v1998_v16  ;;  %v1104_v36 = vsel %vm431_vm2, %v1998_v16, 0.0 }
 0x4dd   : > { %1905 = vmatpush3.xpose.msk.msra.mxu0 %vm276_vm1, %v1269_v7  ;;  %1906 = vmatprep.mubr.msk.f32.mxu0 %vm2189_vm0, %v2188_v0 }
 0x4de   : > { %1914 = vmatprep.subr.mxu0 %v2188_v0 }
 0x4df   : > { %v2000_v3 = vpop.eup %1999 }
 0x4e0   : > { %1902 = vmatmul.mubr.msk.f32.vlgmr.msra.gmra.mrb[10].mxu1 %vm431_vm2, %v2000_v3  ;;  %1907 = vmatmul.mubr.msk.f32.vlgmr.msra.gmra.mrb[12].mxu0 %vm276_vm1, %v1267_v2  ;;  %v1107_v35 = vsel %vm431_vm2, %v2000_v3, 0.0 }
 0x4e1   : > { %1910 = vmatpush3.xpose.msk.msra.mxu1 %vm276_vm1, %v1347_v17  ;;  %1911 = vmatprep.mubr.msk.f32.mxu1 %vm2189_vm0, %v2188_v0 }
 0x4e2   : > { %1916 = vmatprep.mubr.msk.f32.mxu0 %vm2189_vm0, %v2188_v0  ;;  %1919 = vmatprep.subr.mxu1 %v2188_v0 }
 0x4e4   : > { %1912 = vmatmul.mubr.msk.f32.vlgmr.msra.gmra.mrb[12].mxu1 %vm276_vm1, %v1345_v4 }
 0x4e5   : > { %1921 = vmatprep.mubr.msk.f32.mxu1 %vm2189_vm0, %v2188_v0  ;;  %v770_v0 = vsel %vm431_vm2, %v2519_v49, 0.0 }
 0x5af   : > { %v2571_v18 = vpop.f32.mrb[10].mxu0 }
 0x5b0   : > { %v1898_v19 = vpop.f32.mrb[11].mxu0 }
 0x5b3   : > { %v1258_v20 = vpop.f32.mrb[10].mxu1  ;;  %v1340_v21 = vpop.f32.mrb[12].mxu0 }
 0x5b4   : > { %v1422_v23 = vmul.f32 0.17677669, %v1340_v21  ;;  %v1903_v24 = vpop.f32.mrb[11].mxu1  ;;  %v1908_v26 = vpop.f32.mrb[13].mxu0 }
 0x5b6   : > { %v1424_v27 = vsel %vm431_vm2, %v1422_v23, -inf }
 0x5b7   : > { %v1418_v29 = vpop.f32.mrb[12].mxu1  ;;  %1425 = vmax.xlane.f32.xlu1 %v1424_v27 }
 0x5b8   : > { %v1423_v31 = vmul.f32 0.17677669, %v1418_v29  ;;  %v1913_v32 = vpop.f32.mrb[13].mxu1 }
 0x5ba   : > { %v1427_v33 = vsel %vm431_vm2, %v1423_v31, -inf }
 0x5bb   : > { %1428 = vmax.xlane.f32.xlu0 %v1427_v33 }
 0x5c8   : > { %1518 = vrot.lane.b32.xlu1 %v2464_v14, %s2192_s11 }
 0x5d1   : > { %1442 = vrot.lane.b32.xlu0 %v2461_v13, %s2192_s11 }
 0x5ec   : > { %771 = vadd.xlane.f32.xlu1 %v770_v0 }
 0x5f0   : > { %774 = vadd.xlane.f32.xlu0 %v773_v34  ;;  %1108 = vadd.xlane.f32.xlu1 %v1107_v35 }
 0x5f4   : > { %1105 = vadd.xlane.f32.xlu0 %v1104_v36 }
 0x644   : > { %v1426_v37 = vpop.xlane.xlu1 %1425 }
 0x645   : > { %v1430_v38 = vsub.f32 %v1422_v23, %v1426_v37 }
 0x647   : > { %v1432_v14 = vmul.f32 1.442695, %v1430_v38 }
 0x648   : > { %v1429_v39 = vpop.xlane.xlu0 %1428  ;;  %v1519_v40 = vpop.permute.xlu1 %1518 }
 0x649   : > { %2001 = vpow2.f32 %v1432_v14  ;;  %v1431_v13 = vsub.f32 %v1423_v31, %v1429_v39  ;;  %1920 = vmatpush3.msra.mxu1 %v1519_v40 }
 0x64b   : > { %v1434_v41 = vmul.f32 1.442695, %v1431_v13 }
 0x64c   : > { %v1443_v42 = vpop.permute.xlu0 %1442 }
 0x64d   : > { %2003 = vpow2.f32 %v1434_v41  ;;  %1915 = vmatpush3.msra.mxu0 %v1443_v42 }
 0x653   : > { %v2002_v43 = vpop.eup %2001 }
 0x654   : > { %1917 = vmatmul.mubr.msk.f32.vlgmr.msra.gmra.mrb[14].mxu0 %vm431_vm2, %v2002_v43  ;;  %v1436_v44 = vsel %vm431_vm2, %v2002_v43, 0.0 }
 0x655   : > { %1437 = vadd.xlane.f32.xlu0 %v1436_v44 }
 0x657   : > { %v2004_v45 = vpop.eup %2003 }
 0x658   : > { %1922 = vmatmul.mubr.msk.f32.vlgmr.msra.gmra.mrb[14].mxu1 %vm431_vm2, %v2004_v45  ;;  %v1439_v46 = vsel %vm431_vm2, %v2004_v45, 0.0 }
 0x659   : > { %1440 = vadd.xlane.f32.xlu1 %v1439_v46  ;;  %445 = vadd.xlane.f32.xlu0 %v444_v47 }
 0x65d   : > { %448 = vadd.xlane.f32.xlu1 %v447_v48 }
 0x679   : > { %v772_v49 = vpop.xlane.xlu1 %771 }
 0x67a   : > { %2005 = vrcp.f32 %v772_v49 }
 0x67d   : > { %v775_v50 = vpop.xlane.xlu0 %774  ;;  %v1109_v51 = vpop.xlane.xlu1 %1108 }
 0x67e   : > { %2007 = vrcp.f32 %v775_v50 }
 0x67f   : > { %2009 = vrcp.f32 %v1109_v51 }
 0x681   : > { %v1106_v52 = vpop.xlane.xlu0 %1105 }
 0x682   : > { %2011 = vrcp.f32 %v1106_v52 }
 0x684   : > { %v2006_v53 = vpop.eup %2005 }
 0x685   : > { %v931_v54 = vmul.f32 %v2006_v53, %v2543_v55 }
 0x687   : > { %1600 = vrot.lane.b32.xlu0 %v931_v54, %s2192_s11 }
 0x688   : > { %v2008_v22 = vpop.eup %2007 }
 0x689   : > { %v2010_v56 = vpop.eup %2009  ;;  %v933_v58 = vmul.f32 %v2008_v22, %v2545_v57 }
 0x68a   : > { %v1265_v59 = vmul.f32 %v2010_v56, %v1258_v20 }
 0x68b   : > { %1602 = vrot.lane.b32.xlu1 %v933_v58, %s2192_s11 }
 0x68c   : > { %v2012_v25 = vpop.eup %2011  ;;  %1610 = vrot.lane.b32.xlu0 %v1265_v59, %s2191_s4 }
 0x68d   : > { %v1263_v60 = vmul.f32 %v2012_v25, %v2571_v18 }
 0x68f   : > { %1608 = vrot.lane.b32.xlu1 %v1263_v60, %s2191_s4 }
 0x6e2   : > { %v1438_v61 = vpop.xlane.xlu0 %1437 }
 0x6e3   : > { %2013 = vrcp.f32 %v1438_v61 }
 0x6e6   : > { %v1441_v62 = vpop.xlane.xlu1 %1440  ;;  %v446_v9 = vpop.xlane.xlu0 %445 }
 0x6e7   : > { %2015 = vrcp.f32 %v1441_v62 }
 0x6e8   : > { %2017 = vrcp.f32 %v446_v9 }
 0x6ea   : > { %v449_v10 = vpop.xlane.xlu1 %448 }
 0x6eb   : > { %2019 = vrcp.f32 %v449_v10 }
 0x6ed   : > { %v2014_v55 = vpop.eup %2013 }
 0x6f1   : > { %v2016_v57 = vpop.eup %2015 }
 0x6f2   : > { %v2018_v12 = vpop.eup %2017 }
 0x6f3   : > { %v597_v2 = vmul.f32 %v2018_v12, %v2496_v28 }
 0x6f5   : > { %v2020_v16 = vpop.eup %2019 }
 0x6f6   : > { %v599_v4 = vmul.f32 %v2020_v16, %v2498_v30 }
 0x6f9   : > { %v1601_v15 = vpop.permute.xlu0 %1600 }
 0x6fa   : > { %v1622_v3 = vsel %vm276_vm1, %v597_v2, %v1601_v15 }
 0x6fd   : > { %v1603_v11 = vpop.permute.xlu1 %1602 }
 0x6fe   : > { %v1611_v18 = vpop.permute.xlu0 %1610  ;;  %v1623_v21 = vsel %vm276_vm1, %v599_v4, %v1603_v11 }
 0x6ff   : > { %v1626_v30 = vsel %vm1624_vm4, %v1623_v21, %v1611_v18 }
 0x701   : > { %v1609_v17 = vpop.permute.xlu1 %1608 }
 0x702   : > { %v1625_v19 = vsel %vm1624_vm4, %v1622_v3, %v1609_v17 }
 0x727   : > { %v1514_v63 = vpop.f32.mrb[14].mxu0 }
 0x728   : > { %v1595_v1 = vmul.f32 %v2014_v55, %v1514_v63  ;;  %v1918_v5 = vpop.f32.mrb[15].mxu0 }
 0x72a   : > { %1616 = vrot.lane.b32.xlu1 %v1595_v1, %s2190_s22 }
 0x72b   : > { %v1590_v6 = vpop.f32.mrb[14].mxu1 }
 0x72c   : > { %v1597_v7 = vmul.f32 %v2016_v57, %v1590_v6  ;;  %v1923_v8 = vpop.f32.mrb[15].mxu1 }
 0x72e   : > { %1618 = vrot.lane.b32.xlu0 %v1597_v7, %s2190_s22 }
 0x79c   : > { %v1617_v20 = vpop.permute.xlu1 %1616 }
 0x79d   : > { %v1628_v23 = vsel %vm1627_vm3, %v1625_v19, %v1617_v20 }
 0x79e   : > { %1630 = vst [vmem:[%s265_s30] sm:$0xff] %v1628_v23 }
 0x7a0   : > { %v1619_v28 = vpop.permute.xlu0 %1618 }
 0x7a1   : > { %v1629_v24 = vsel %vm1627_vm3, %v1626_v30, %v1619_v28 }
 0x7a2   : > { %1631 = vst [vmem:[%s265_s30 + $0x8] sm:$0xff] %v1629_v24 }
 0x7a3   : > { %2124 = shalt.err (!%p2121_p9)
}
 0x7a4   : > { %s2125_s9 = scalar_lea.hbm %s2614_s0, 256  ;;  %s2129_s17 = scalar_lea.hbm %s2661_s3, 1024 }
 0x7a5   : > { %p2126_p11 = scmp.ne.s32.totalorder %s2614_s0, %s2125_s9  ;;  %p2130_p4 = scmp.lt.u32.totalorder %s2614_s0, %s2661_s3 }
 0x7a6   : > { %p2131_p1 = scmp.lt.u32.totalorder %s2129_s17, %s2125_s9  ;;  %p2133_p12 = scmp.lt.u32.totalorder %s2125_s9, %s2614_s0 }
 0x7a7   : > { %p2127_p7 = pnand %p2126_p11, %p2681_p5 }
 0x7a8   : > { %p2132_p0 = por %p2131_p1, %p2130_p4 }
 0x7a9   : > { %p2128_p2 = pneg %p2127_p7 }
 0x7aa   : > { %p2134_p6 = por %p2133_p12, %p2132_p0 }
 0x7ac   : > { %p2135_p10 = pnand %p2134_p6, %p2128_p2 }
 0x7ae   : > { %2138 = shalt.err (!%p2135_p10)
}
 0x7af   : > { %s2194_s4 = smov 128   ;;  %s2195_s11 = smov 8  }
 0x7b0   : > { %1930 = dma.vmem_to_hbm [thread:$0]  (%p2681_p5), %s2609_s6, 256, %s2614_s0, %s1633_s16, %s2194_s4, %s2194_s4, %s2195_s11  }
 0x7b1 PF: > { %p1947_p13 = scmp.ge.s32.totalorder %s2181_s15, 2  ;;  %s1661_s30 = sand.u32 1, %s2169_s12  }
 0x7b2   : > { %p2682_p3 = scmp.ne.s32.totalorder %s2671_s24, 0  ;;  %s1662_s5 = scalar_lea.sflag [#allocation4], %s1661_s30 }
 0x7b4   : > { %p1943_p8 = pnand %p1947_p13, %p2682_p3 }
 0x7b6   : > { %2164 = dma.done.wait (!%p1943_p8), %s1662_s5, 256  }
 0x7b7   : > { %2166 = vsyncadd (!%p1943_p8), %s1662_s5, 4294967040  ;;  %p19_p9 = scmp.ge.s32.totalorder %s2241_s18, 6   ;;  %s2683_s12 = smov %s2173_s13 }
 0x7b8   : > { %s2684_s13 = smov %s2177_s14  ;;  %s2685_s14 = smov %s2253_s21 }
 0x7b9   : > { %s2686_s15 = smov %s2241_s18  ;;  %21 = sbr.rel (!%p19_p9) target bundleno = 9 (0x9), region = 101 }
 0x7c0   :  { %1667 = vsyncpa [#allocation3], 1 }
 0x7c1   :  { %1669 = vsyncpa [#allocation3 + $0x1], 1 }
 0x7c2   :  { %1670 = vsyncpa [#allocation6], 1 }
 0x7c3   :  { %1672 = vsyncpa [#allocation6 + $0x1], 1 }
 0x7c4   :  { %1673 = vsyncpa [#allocation4], 1 }
 0x7c5   :  { %1675 = vsyncpa [#allocation4 + $0x1], 1 }

</bundles_post_ra>
